<compile_context>
chip_gen: v7x
topology: tpu7x:2x2x1
jax: 0.10.0
libtpu: 0.0.40
codegen_flags: <defaults>
</compile_context>

<pallas_src>
import functools

import jax
import jax.numpy as jnp
from jax.experimental import pallas as pl
from jax.experimental.pallas import tpu as pltpu

LN_EPS = 1e-5  # nn.LayerNorm default


def _round_up(n, m):
    return ((n + m - 1) // m) * m


def _vmem_capacity_bytes():
    """Physical VMEM per TensorCore; conservative fallback = v7x (64 MiB)."""
    try:
        info = pltpu.get_tpu_info()
        cap = getattr(info, "vmem_capacity_bytes", None)
        if cap:
            return int(cap)
    except Exception:
        pass
    return 64 << 20


def _layer_norm_f32(x_f32, gamma_f32, beta_f32):
    """One-pass LN statistics (E[x^2] - mean^2); biased variance like torch."""
    mean = jnp.mean(x_f32, axis=-1, keepdims=True)
    mean_sq = jnp.mean(x_f32 * x_f32, axis=-1, keepdims=True)
    var = mean_sq - mean * mean
    y = (x_f32 - mean) * jax.lax.rsqrt(var + LN_EPS)
    return y * gamma_f32 + beta_f32


def _sublayer_kernel_full_w(x_ref, gamma_ref, beta_ref, w_ref, b_ref, o_ref):
    """Grid = (token tiles,).  Full weight matrix resident in VMEM.

    x_ref:     (TM, D)  input token tile
    gamma_ref: (1, D)   LayerNorm weight
    beta_ref:  (1, D)   LayerNorm bias
    w_ref:     (D, D)   Linear weight (constant block index -> fetched once)
    b_ref:     (1, D)   Linear bias
    o_ref:     (TM, D)  output tile
    """
    x = x_ref[...].astype(jnp.float32)
    y = _layer_norm_f32(x, gamma_ref[...].astype(jnp.float32),
                        beta_ref[...].astype(jnp.float32))
    # Feed the MXU directly (no scratch round-trip); f32 accumulation.
    s = jnp.dot(y.astype(w_ref.dtype), w_ref[...],
                preferred_element_type=jnp.float32)
    s = s + b_ref[...].astype(jnp.float32)
    # Dropout is eval-mode (identity); residual add in f32, lane-dense store.
    # TODO(synk): training-mode dropout would use pltpu.prng_seed +
    # pltpu.stateful_bernoulli with 1/(1-p) scaling; eval semantics = identity.
    o_ref[...] = (x + s).astype(o_ref.dtype)


def _sublayer_kernel_tiled(x_ref, xres_ref, gamma_ref, beta_ref, w_ref, b_ref,
                           o_ref, y_ref):
    """Grid = (token tiles, output-feature tiles).  Fallback for very large D.

    x_ref:     (TM, D)   full-feature token tile (for LayerNorm, resident per i)
    xres_ref:  (TM, TN)  residual slice of x for this output-feature block
    gamma_ref: (1, D)    LayerNorm weight
    beta_ref:  (1, D)    LayerNorm bias
    w_ref:     (D, TN)   Linear weight slab for output features [j*TN, (j+1)*TN)
    b_ref:     (1, TN)   Linear bias slab
    o_ref:     (TM, TN)  output tile
    y_ref:     (TM, D)   VMEM scratch: LayerNorm(x) in the matmul dtype,
                         recomputed only when the token tile changes (j == 0).
    """
    j = pl.program_id(1)

    @pl.when(j == 0)
    def _():
        x = x_ref[...].astype(jnp.float32)
        y = _layer_norm_f32(x, gamma_ref[...].astype(jnp.float32),
                            beta_ref[...].astype(jnp.float32))
        y_ref[...] = y.astype(y_ref.dtype)

    s = jnp.dot(y_ref[...], w_ref[...], preferred_element_type=jnp.float32)
    s = s + b_ref[...].astype(jnp.float32)
    o_ref[...] = (xres_ref[...].astype(jnp.float32) + s).astype(o_ref.dtype)


def _select_tiles(N, D, x_item, w_item, dot_item, ln_item, bias_item,
                  token_tile, feature_tile, budget):
    """Pick (tm, tn, vmem_footprint_bytes) honoring the VMEM budget."""
    sub = max(8, 32 // x_item)          # sublane packing of the input dtype

    def footprint(tm_, tn_):
        f = (2 * tm_ * D * x_item       # x tiles (double-buffered)
             + 2 * D * tn_ * w_item     # W slabs
             + 2 * tm_ * tn_ * x_item   # out tiles
             + 4 * D * ln_item          # gamma + beta
             + 2 * tn_ * bias_item      # bias slab
             + (2 << 20))               # headroom
        if tn_ < D:
            f += tm_ * D * dot_item         # LayerNorm(x) scratch
            f += 2 * tm_ * tn_ * x_item     # residual x view
        return f

    # ---- token tile ----
    if token_tile is not None:
        assert token_tile % sub == 0, (
            f"token_tile must be a multiple of the sublane packing ({sub})")
        tm = token_tile
    else:
        pref = 512 if D <= 512 else 256      # small-D cases are HBM/overhead bound
        tm = min(pref, _round_up(N, sub))
        # Feed both v7x TensorCores: ensure >= 2 token tiles whenever there is
        # more than one sublane-row of work.
        if N > sub and _round_up(N, tm) // tm < 2:
            tm = max(sub, _round_up(-(-N // 2), sub))

    # ---- feature tile ----
    if feature_tile is not None:
        assert D % feature_tile == 0, "feature dim must divide by feature_tile"
        assert feature_tile == D or feature_tile % 128 == 0, (
            "feature_tile must be lane-dense (multiple of 128) or == D")
        return tm, feature_tile, footprint(tm, feature_tile)

    # Prefer full-weight residency: W is then DMA'd from HBM exactly once.
    if footprint(tm, D) <= budget:
        return tm, D, footprint(tm, D)

    # Shrink the token tile before giving up on full-W residency (restreaming
    # W costs (Np/tm) * D*D bytes from HBM, far worse than a smaller MXU M).
    if token_tile is None:
        for tm_try in (256, 128, 64, sub):
            tm_try = min(_round_up(N, sub), max(sub, _round_up(tm_try, sub)))
            if tm_try < tm and footprint(tm_try, D) <= budget:
                return tm_try, D, footprint(tm_try, D)

    # Feature-tiled fallback: largest token tile first (W restream factor is
    # Np/tm), then the largest lane-dense feature tile that fits.
    tn_cands = [t for t in range(((D - 1) // 128) * 128, 0, -128) if D % t == 0]
    if not tn_cands:
        return tm, D, footprint(tm, D)       # cannot tile cleanly; best effort
    tm_cands = [token_tile] if token_tile is not None else [1024, 512, 256, 128, 64]
    for tm_try in tm_cands:
        tm_try = min(_round_up(N, sub), max(sub, _round_up(tm_try, sub)))
        for tn_try in tn_cands:
            if footprint(tm_try, tn_try) <= budget:
                return tm_try, tn_try, footprint(tm_try, tn_try)
    tm_min = max(sub, min(_round_up(N, sub), 64))
    return tm_min, tn_cands[-1], footprint(tm_min, tn_cands[-1])


@functools.partial(jax.jit,
                   static_argnames=("token_tile", "feature_tile",
                                    "cast_matmul_to_bf16"))
def sublayer_connection(x, gamma, beta, w, b, *, token_tile=None,
                        feature_tile=None, cast_matmul_to_bf16=False):
    """x: (..., D) -> x + Linear(LayerNorm(x)); dropout in eval mode."""
    orig_shape = x.shape
    D = orig_shape[-1]
    x2 = x.reshape(-1, D)
    N = x2.shape[0]

    # Matmul storage dtype: whatever W is stored in (bf16 models stay bf16).
    # Optional bf16 cast for f32 models (MXUs are bf16-native); off by default
    # because it changes numerics.
    if cast_matmul_to_bf16 and w.dtype == jnp.float32:
        w = w.astype(jnp.bfloat16)
    dot_dtype = w.dtype

    itemsize = lambda a: jnp.dtype(a.dtype).itemsize
    capacity = _vmem_capacity_bytes()
    budget = int(0.85 * capacity)
    tm, tn, footprint = _select_tiles(
        N, D, itemsize(x), itemsize(w), jnp.dtype(dot_dtype).itemsize,
        itemsize(gamma), itemsize(b), token_tile, feature_tile, budget)
    vmem_bytes = int(min(max(footprint, 16 << 20), int(0.9 * capacity)))

    Np = _round_up(N, tm)
    if Np != N:
        x2 = jnp.pad(x2, ((0, Np - N), (0, 0)))   # tail rows, sliced off below

    gamma2 = gamma.reshape(1, D)
    beta2 = beta.reshape(1, D)
    b2 = b.reshape(1, D)

    if tn == D:
        # Full weight resident in VMEM; W/gamma/beta/bias have constant block
        # indices so they are fetched from HBM exactly once.
        out = pl.pallas_call(
            _sublayer_kernel_full_w,
            out_shape=jax.ShapeDtypeStruct((Np, D), x.dtype),
            grid_spec=pltpu.PrefetchScalarGridSpec(
                num_scalar_prefetch=0,
                grid=(Np // tm,),
                in_specs=[
                    pl.BlockSpec((tm, D), lambda i: (i, 0)),   # x tile
                    pl.BlockSpec((1, D), lambda i: (0, 0)),    # gamma
                    pl.BlockSpec((1, D), lambda i: (0, 0)),    # beta
                    pl.BlockSpec((D, D), lambda i: (0, 0)),    # W (fetched once)
                    pl.BlockSpec((1, D), lambda i: (0, 0)),    # bias
                ],
                out_specs=pl.BlockSpec((tm, D), lambda i: (i, 0)),
            ),
            compiler_params=pltpu.CompilerParams(
                dimension_semantics=("parallel",),
                vmem_limit_bytes=vmem_bytes,
            ),
        )(x2, gamma2, beta2, w, b2)
    else:
        # Feature-tiled fallback for W too large for VMEM residency.
        out = pl.pallas_call(
            _sublayer_kernel_tiled,
            out_shape=jax.ShapeDtypeStruct((Np, D), x.dtype),
            grid_spec=pltpu.PrefetchScalarGridSpec(
                num_scalar_prefetch=0,
                grid=(Np // tm, D // tn),
                in_specs=[
                    pl.BlockSpec((tm, D), lambda i, j: (i, 0)),   # x (LN view)
                    pl.BlockSpec((tm, tn), lambda i, j: (i, j)),  # x (residual)
                    pl.BlockSpec((1, D), lambda i, j: (0, 0)),    # gamma
                    pl.BlockSpec((1, D), lambda i, j: (0, 0)),    # beta
                    pl.BlockSpec((D, tn), lambda i, j: (0, j)),   # W slab
                    pl.BlockSpec((1, tn), lambda i, j: (0, j)),   # bias slab
                ],
                out_specs=pl.BlockSpec((tm, tn), lambda i, j: (i, j)),
                scratch_shapes=[pltpu.VMEM((tm, D), dot_dtype)],  # cached LN(x)
            ),
            compiler_params=pltpu.CompilerParams(
                dimension_semantics=("parallel", "arbitrary"),
                vmem_limit_bytes=vmem_bytes,
            ),
        )(x2, x2, gamma2, beta2, w, b2)

    if Np != N:
        out = out[:N]
    return out.reshape(orig_shape)


def _reference(x, gamma, beta, w, b):
    """Pure-JAX reference of the same forward pass."""
    xf = x.astype(jnp.float32)
    mean = jnp.mean(xf, axis=-1, keepdims=True)
    var = jnp.mean((xf - mean) ** 2, axis=-1, keepdims=True)
    y = (xf - mean) * jax.lax.rsqrt(var + LN_EPS) * gamma + beta
    s = y @ w.astype(jnp.float32) + b
    return (xf + s).astype(x.dtype)


def _make_inputs(key, batch, seq, size, dtype=jnp.float32):
    k_x, k_g, k_b, k_w, k_bias = jax.random.split(key, 5)
    x = jax.random.normal(k_x, (batch, seq, size), dtype=dtype)
    gamma = (jnp.ones((size,), jnp.float32)
             + 0.01 * jax.random.normal(k_g, (size,), dtype=jnp.float32))
    beta = 0.01 * jax.random.normal(k_b, (size,), dtype=jnp.float32)
    w = (jax.random.normal(k_w, (size, size), dtype=jnp.float32)
         / jnp.sqrt(jnp.float32(size))).astype(dtype)
    b = 0.01 * jax.random.normal(k_bias, (size,), dtype=jnp.float32)
    return x, gamma, beta, w, b


if __name__ == "__main__":
    key = jax.random.PRNGKey(0)
    k1, k2, k3 = jax.random.split(key, 3)

    # Case 1: small lane-dense input -> full-W path, two token tiles
    # (exercises the megacore split of the parallel token axis).
    x, gamma, beta, w, b = _make_inputs(k1, batch=2, seq=8, size=128)
    out = jax.block_until_ready(sublayer_connection(x, gamma, beta, w, b))
    ref = _reference(x, gamma, beta, w, b)
    assert out.shape == x.shape and out.dtype == x.dtype
    assert jnp.allclose(out, ref, atol=1e-4, rtol=1e-4), "mismatch (case 1)"

    # Case 2: non-divisible token count -> padding path, full-W kernel
    # (4*160 = 640 tokens, tm = 512, padded to 1024, grid (2,)).
    x, gamma, beta, w, b = _make_inputs(k2, batch=4, seq=160, size=128)
    out = jax.block_until_ready(sublayer_connection(x, gamma, beta, w, b))
    ref = _reference(x, gamma, beta, w, b)
    assert out.shape == x.shape and out.dtype == x.dtype
    assert jnp.allclose(out, ref, atol=1e-4, rtol=1e-4), "mismatch (case 2)"

    # Case 3: forced feature tiling -> exercises the tiled fallback path
    # (grid (3, 2), LayerNorm cached in VMEM scratch across the j axis).
    x, gamma, beta, w, b = _make_inputs(k3, batch=2, seq=24, size=256)
    out = jax.block_until_ready(
        sublayer_connection(x, gamma, beta, w, b,
                            token_tile=16, feature_tile=128))
    ref = _reference(x, gamma, beta, w, b)
    assert out.shape == x.shape and out.dtype == x.dtype
    assert jnp.allclose(out, ref, atol=1e-4, rtol=1e-4), "mismatch (case 3)"

    print("KERNEL_OK")
</pallas_src>

<mosaic_0001>
module attributes {stable_mosaic.version = 11 : i64} {
  func.func @_sublayer_kernel_full_w(%arg0: i32, %arg1: memref<8x128xf32, #tpu.memory_space<vmem>>, %arg2: memref<1x128xf32, #tpu.memory_space<vmem>>, %arg3: memref<1x128xf32, #tpu.memory_space<vmem>>, %arg4: memref<128x128xf32, #tpu.memory_space<vmem>>, %arg5: memref<1x128xf32, #tpu.memory_space<vmem>>, %arg6: memref<8x128xf32, #tpu.memory_space<vmem>>) attributes {dimension_semantics = [#tpu.dimension_semantics<parallel>], iteration_bounds = array<i64: 2>, scalar_prefetch = 0 : i64, scratch_operands = 0 : i64, tpu.core_type = #tpu.core_type<tc>, window_params = [{transform_indices = @transform_0, window_bounds = array<i64: 8, 128>}, {pipeline_mode = #tpu.pipeline_mode<synchronous>, transform_indices = @transform_1, window_bounds = array<i64: 1, 128>}, {pipeline_mode = #tpu.pipeline_mode<synchronous>, transform_indices = @transform_2, window_bounds = array<i64: 1, 128>}, {pipeline_mode = #tpu.pipeline_mode<synchronous>, transform_indices = @transform_3, window_bounds = array<i64: 128, 128>}, {pipeline_mode = #tpu.pipeline_mode<synchronous>, transform_indices = @transform_4, window_bounds = array<i64: 1, 128>}, {transform_indices = @transform_5, window_bounds = array<i64: 8, 128>}]} {
    %c0 = arith.constant 0 : index
    %c0_0 = arith.constant 0 : index
    %0 = vector.load %arg1[%c0, %c0_0] : memref<8x128xf32, #tpu.memory_space<vmem>>, vector<8x128xf32>
    %c0_1 = arith.constant 0 : index
    %c0_2 = arith.constant 0 : index
    %1 = vector.load %arg2[%c0_1, %c0_2] : memref<1x128xf32, #tpu.memory_space<vmem>>, vector<1x128xf32>
    %c0_3 = arith.constant 0 : index
    %c0_4 = arith.constant 0 : index
    %2 = vector.load %arg3[%c0_3, %c0_4] : memref<1x128xf32, #tpu.memory_space<vmem>>, vector<1x128xf32>
    %cst = arith.constant dense<0.000000e+00> : vector<8xf32>
    %3 = vector.multi_reduction <add>, %0, %cst [1] : vector<8x128xf32> to vector<8xf32>
    %4 = vector.shape_cast %3 : vector<8xf32> to vector<8x1xf32>
    %cst_5 = arith.constant 1.280000e+02 : f32
    %5 = vector.broadcast %cst_5 : f32 to vector<8x1xf32>
    %6 = arith.divf %4, %5 : vector<8x1xf32>
    %7 = arith.mulf %0, %0 : vector<8x128xf32>
    %cst_6 = arith.constant dense<0.000000e+00> : vector<8xf32>
    %8 = vector.multi_reduction <add>, %7, %cst_6 [1] : vector<8x128xf32> to vector<8xf32>
    %9 = vector.shape_cast %8 : vector<8xf32> to vector<8x1xf32>
    %cst_7 = arith.constant 1.280000e+02 : f32
    %10 = vector.broadcast %cst_7 : f32 to vector<8x1xf32>
    %11 = arith.divf %9, %10 : vector<8x1xf32>
    %12 = arith.mulf %6, %6 : vector<8x1xf32>
    %13 = arith.subf %11, %12 : vector<8x1xf32>
    %14 = vector.broadcast %6 : vector<8x1xf32> to vector<8x128xf32>
    %15 = arith.subf %0, %14 : vector<8x128xf32>
    %cst_8 = arith.constant 9.99999974E-6 : f32
    %16 = vector.broadcast %cst_8 : f32 to vector<8x1xf32>
    %17 = arith.addf %13, %16 : vector<8x1xf32>
    %18 = math.rsqrt %17 : vector<8x1xf32>
    %19 = vector.broadcast %18 : vector<8x1xf32> to vector<8x128xf32>
    %20 = arith.mulf %15, %19 : vector<8x128xf32>
    %21 = vector.broadcast %1 : vector<1x128xf32> to vector<8x128xf32>
    %22 = arith.mulf %20, %21 : vector<8x128xf32>
    %23 = vector.broadcast %2 : vector<1x128xf32> to vector<8x128xf32>
    %24 = arith.addf %22, %23 : vector<8x128xf32>
    %c0_9 = arith.constant 0 : index
    %c0_10 = arith.constant 0 : index
    %25 = vector.load %arg4[%c0_9, %c0_10] : memref<128x128xf32, #tpu.memory_space<vmem>>, vector<128x128xf32>
    %cst_11 = arith.constant dense<0.000000e+00> : vector<8x128xf32>
    %26 = tpu.matmul %24, %25, %cst_11 {dimension_numbers = #tpu.dot_dimension_numbers<[1], [0], [0], [1], [0, 0, 1, 1], [], []>} : vector<8x128xf32>, vector<128x128xf32>, vector<8x128xf32> -> vector<8x128xf32>
    %c0_12 = arith.constant 0 : index
    %c0_13 = arith.constant 0 : index
    %27 = vector.load %arg5[%c0_12, %c0_13] : memref<1x128xf32, #tpu.memory_space<vmem>>, vector<1x128xf32>
    %28 = vector.broadcast %27 : vector<1x128xf32> to vector<8x128xf32>
    %29 = arith.addf %26, %28 : vector<8x128xf32>
    %30 = arith.addf %0, %29 : vector<8x128xf32>
    %c0_14 = arith.constant 0 : index
    %c0_15 = arith.constant 0 : index
    %31 = vector.load %arg6[%c0_14, %c0_15] : memref<8x128xf32, #tpu.memory_space<vmem>>, vector<8x128xf32>
    tpu.vector_store %arg6[%c0_14, %c0_15], %30 {strides = array<i32>} : memref<8x128xf32, #tpu.memory_space<vmem>>, vector<8x128xf32>,
    return
  }
  func.func @transform_0(%arg0: i32) -> (i32, i32) {
    %c0_i32 = arith.constant 0 : i32
    %c0_i32_0 = arith.constant 0 : i32
    return %arg0, %c0_i32 : i32, i32
  }
  func.func @transform_1(%arg0: i32) -> (i32, i32) {
    %c0_i32 = arith.constant 0 : i32
    %c0_i32_0 = arith.constant 0 : i32
    %c0_i32_1 = arith.constant 0 : i32
    return %c0_i32, %c0_i32_0 : i32, i32
  }
  func.func @transform_2(%arg0: i32) -> (i32, i32) {
    %c0_i32 = arith.constant 0 : i32
    %c0_i32_0 = arith.constant 0 : i32
    %c0_i32_1 = arith.constant 0 : i32
    return %c0_i32, %c0_i32_0 : i32, i32
  }
  func.func @transform_3(%arg0: i32) -> (i32, i32) {
    %c0_i32 = arith.constant 0 : i32
    %c0_i32_0 = arith.constant 0 : i32
    %c0_i32_1 = arith.constant 0 : i32
    return %c0_i32, %c0_i32_0 : i32, i32
  }
  func.func @transform_4(%arg0: i32) -> (i32, i32) {
    %c0_i32 = arith.constant 0 : i32
    %c0_i32_0 = arith.constant 0 : i32
    %c0_i32_1 = arith.constant 0 : i32
    return %c0_i32, %c0_i32_0 : i32, i32
  }
  func.func @transform_5(%arg0: i32) -> (i32, i32) {
    %c0_i32 = arith.constant 0 : i32
    %c0_i32_0 = arith.constant 0 : i32
    return %arg0, %c0_i32 : i32, i32
  }
}

</mosaic_0001>

<bundles_post_ra>
// kernel: sublayer_connection.1
= control target key start
LH: loop header
LB: loop body
LE: loop exit
PB: predicated region body
PF: predicated region fallthrough
CT: control target
= control target key end

     0   :  { %10 = vsyncpa [#allocation3], 0  ;;  %s1016_s0 = inlined_call_operand.hbm [shape: f32[16,128], index: 0, kind: input, shape index: {}]   ;;  %s1017_s1 = inlined_call_operand.vmem [shape: f32[1,128], index: 1, kind: input, shape index: {}]   ;;  %s1018_s2 = inlined_call_operand.vmem [shape: f32[1,128], index: 2, kind: input, shape index: {}]   ;;  %s1019_s3 = inlined_call_operand.hbm [shape: f32[128,128], index: 3, kind: input, shape index: {}]   ;;  %s1020_s4 = inlined_call_operand.vmem [shape: f32[1,128], index: 4, kind: input, shape index: {}]   ;;  %s1021_s5 = inlined_call_operand.hbm [shape: f32[16,128], index: 5, kind: output, shape index: {}]  }
   0x1   :  { %12 = vsyncpa [#allocation3 + $0x1], 0 }
   0x2   :  { %13 = vsyncpa [#allocation6], 0 }
   0x3   :  { %14 = vsyncpa [#allocation4], 0 }
   0x4   :  { %16 = vsyncpa [#allocation4 + $0x1], 0  ;;  %s800_s18 = smov 0   ;;  %s802_s19 = smov 0  }
   0x5   :  { %s804_s20 = smov 0   ;;  %s806_s21 = smov 0  }
   0x6 LB: > { %s821_s22 = sadd.s32 4294967295, %s760_s21   ;;  %s475_s23 = sadd.s32 4294967294, %s760_s21   ;;  %s760_s21 = sphi %s806_s21, %s1041_s21   ;;  %s756_s20 = sphi %s804_s20, %s1040_s20   ;;  %s752_s19 = sphi %s802_s19, %s1039_s19   ;;  %s748_s18 = sphi %s800_s18, %s1038_s18  }
   0x7   : > { %p42_p0 = scmp.ne.s32.totalorder %s752_s19, %s748_s18  ;;  %p1022_p1 = scmp.eq.s32.totalorder %s821_s22, 0 }
   0x8   : > { %p156_p3 = scmp.eq.s32.totalorder %s475_s23, 1  ;;  %p476_p5 = scmp.ge.s32.totalorder %s760_s21, 1 }
   0x9   : > { %p830_p4 = por %p1022_p1, %p42_p0  ;;  %p163_p7 = scmp.lt.s32.totalorder %s760_s21, 3 }
   0xa   : > { %p835_p6 = por %p156_p3, %p42_p0  ;;  %s762_s27 = smov [#allocation5]  }
   0xb   : > { %s1025_s24 = scalar_select %p830_p4, 1, 0 }
   0xc   : > { %s1026_s25 = scalar_select %p835_p6, 1, 0 }
   0xd   : > { %p840_p8 = pnand %p476_p5, %p163_p7  ;;  %s181_s28 = sshll.u32 %s762_s27, 4  ;;  %s844_s28 = int_to_ptr.vmem [resolvable:$true] %s181_s28 }
   0xe   : > { %s856_s30 = sadd.s32 1, %s760_s21   ;;  %s29_s6 = sadd.s32 1, %s756_s20 }
   0xf   : > { %s1027_s26 = scalar_select %p840_p8, 1, 0 }
  0x10   : > { %p576_p9 = pneg %p840_p8  ;;  %s26_s7 = ssub.s32 %s760_s21, %s856_s30 }
  0x11   : > { %s632_s10 = scalar_lea.hbm %s1019_s3, 2048 }
  0x12   : > { %p851_p11 = pnand %p576_p9, %p1022_p1  ;;  %p633_p12 = scmp.ne.s32.totalorder %s1019_s3, %s632_s10 }
  0x13   : > { %p639_p5 = scmp.lt.u32.totalorder %s632_s10, %s1019_s3 }
  0x14   : > { %p634_p13 = pneg %p851_p11 }
  0x16   : > { %p635_p0 = pnand %p634_p13, %p633_p12 }
  0x18   : > { %p636_p3 = pneg %p635_p0 }
  0x1a   : > { %p641_p7 = pnand %p639_p5, %p636_p3 }
  0x1c   : > { %644 = shalt.err (!%p641_p7)
}
  0x1d   : > { %s645_s15 = scalar_lea.vmem %s844_s28, 2048  ;;  %p653_p2 = scmp.lt.s32.totalorder %s844_s28, %s844_s28 }
  0x1e   : > { %p646_p9 = scmp.ne.s32.totalorder %s844_s28, %s645_s15  ;;  %p654_p6 = scmp.lt.s32.totalorder %s645_s15, %s645_s15 }
  0x20   : > { %p648_p10 = pnand %p646_p9, %p634_p13  ;;  %p655_p4 = por %p654_p6, %p653_p2 }
  0x22   : > { %p649_p1 = pneg %p648_p10 }
  0x24   : > { %p656_p8 = pnand %p655_p4, %p649_p1 }
  0x26   : > { %659 = shalt.err (!%p656_p8)
}
  0x27   : > { %s763_s16 = smov 128   ;;  %s764_s17 = smov 8  }
  0x28   : > { %579 = dma.hbm_to_vmem [thread:$0]  (!%p851_p11), %s1019_s3, 2048, %s844_s28, [#allocation6], %s763_s16, %s763_s16, %s764_s17  }
  0x29   : > { %p27_p2 = scmp.eq.s32.totalorder %s26_s7, 0  ;;  %p36_p1 = scmp.ne.s32.totalorder %s756_s20, %s752_s19 }
  0x2a   : > { %p37_p4 = scmp.eq.s32.totalorder %s760_s21, 0  ;;  %p589_p6 = scmp.lt.s32.totalorder %s760_s21, 2 }
  0x2b   : > { %s887_s8 = scalar_select %p27_p2, %s756_s20, %s29_s6  }
  0x2c   : > { %p38_p8 = por %p37_p4, %p36_p1  ;;  %p1029_p10 = scmp.eq.s32.totalorder %s821_s22, 1 }
  0x2d   : > { %s198_s10 = sand.u32 1, %s756_s20   ;;  %s480_s11 = sshll.u32 %s760_s21, 7 }
  0x2e   : > { %p891_p12 = por %p1029_p10, %p36_p1  ;;  %s479_s12 = sshll.u32 %s198_s10, 3 }
  0x2f   : > { %s900_s14 = scalar_lea.hbm %s1016_s0, %s480_s11  ;;  %s202_s28 = scalar_lea.vmem [#allocation2], %s479_s12 }
  0x30   : > { %s209_s6 = sshll.u32 %s202_s28, 4  ;;  %p902_p11 = pnand %p589_p6, %p38_p8  ;;  %s906_s6 = int_to_ptr.vmem [resolvable:$true] %s209_s6 }
  0x31   : > { %s199_s15 = scalar_lea.sflag [#allocation3], %s198_s10  ;;  %s660_s16 = scalar_lea.hbm %s900_s14, 128 }
  0x32   : > { %p661_p13 = scmp.ne.s32.totalorder %s900_s14, %s660_s16  ;;  %p662_p0 = pneg %p902_p11 }
  0x33   : > { %s665_s27 = scalar_lea.hbm %s1016_s0, 256  ;;  %p666_p7 = scmp.lt.u32.totalorder %s900_s14, %s1016_s0 }
  0x34   : > { %p663_p3 = pnand %p662_p0, %p661_p13  ;;  %p667_p9 = scmp.lt.u32.totalorder %s665_s27, %s660_s16 }
  0x35   : > { %p669_p1 = scmp.lt.u32.totalorder %s660_s16, %s900_s14 }
  0x36   : > { %p664_p5 = pneg %p663_p3  ;;  %p668_p2 = por %p667_p9, %p666_p7 }
  0x38   : > { %p670_p4 = por %p669_p1, %p668_p2 }
  0x3a   : > { %p671_p6 = pnand %p670_p4, %p664_p5 }
  0x3c   : > { %674 = shalt.err (!%p671_p6)
}
  0x3d   : > { %s675_s10 = scalar_lea.vmem %s906_s6, 128  ;;  %s765_s29 = smov [#allocation2]  }
  0x3e   : > { %p676_p8 = scmp.ne.s32.totalorder %s906_s6, %s675_s10  ;;  %s680_s13 = sshll.u32 %s765_s29, 4  ;;  %s681_s13 = int_to_ptr.vmem [resolvable:$false] %s680_s13 }
  0x3f   : > { %s682_s28 = scalar_lea.vmem %s681_s13, 256  ;;  %p683_p3 = scmp.lt.s32.totalorder %s906_s6, %s681_s13 }
  0x40   : > { %p678_p10 = pnand %p676_p8, %p662_p0  ;;  %p684_p7 = scmp.lt.s32.totalorder %s682_s28, %s675_s10 }
  0x42   : > { %p679_p13 = pneg %p678_p10  ;;  %p685_p9 = por %p684_p7, %p683_p3 }
  0x44   : > { %p686_p2 = pnand %p685_p9, %p679_p13 }
  0x46   : > { %689 = shalt.err (!%p686_p2)
}
  0x47   : > { %583 = dma.hbm_to_vmem [thread:$0]  (!%p902_p11), %s900_s14, 128, %s906_s6, %s199_s15  }
  0x48   : > { %p1032_p5 = scmp.ne.s32.totalorder %s1027_s26, 0 }
  0x49   : > { %s936_s16 = sand.u32 (!%p1032_p5), 1, %s752_s19   ;;  %p1033_p0 = scmp.ne.s32.totalorder (!%p1032_p5), %s1025_s24, 0 }
  0x4a   : > { %218 = sbr.rel (%p1032_p5) target bundleno = 485 (0x1e5), region = 40  ;;  %s482_s17 = sshll.u32 (!%p1032_p5), %s936_s16, 3 }
  0x4b   : > { %s221_s23 = scalar_lea.sflag (!%p1032_p5), [#allocation3], %s936_s16  ;;  %s224_s27 = scalar_lea.vmem (!%p1032_p5), [#allocation2], %s482_s17 }
  0x51   : > { %735 = dma.done.wait (%p1033_p0), %s221_s23, 128  }
  0x52   : > { %737 = vsyncadd (%p1033_p0), %s221_s23, 4294967168  ;;  %p1034_p11 = scmp.eq.s32.totalorder %s821_s22, 0 }
  0x54   : > { %739 = dma.done.wait (%p1034_p11), [#allocation6], 2048   ;;  %p1035_p1 = pmov %p1034_p11 }
  0x55   : > { %v766_v0 = vmov 0.0|0.0   ;;  %v950_v1 = vld [vmem:[%s224_s27] sm:$0xff]  ;;  %v286_v2 = vld [vmem:[#allocation5] sm:$0xff]  ;;  %v287_v3 = vld [vmem:[#allocation5 + $0x8] sm:$0xff]  ;;  %vm767_vm0 = vmmov 0   ;;  %v768_v20 = vmov 0.0  }
  0x56   : > { %741 = vsyncadd (%p1035_p1), [#allocation6], 4294965248  ;;  %544 = vmatprep.subr.bf16.mxu0 %v766_v0  ;;  %258 = vadd.xlane.f32.xlu0 %v950_v1  ;;  %v262_v4 = vmul.f32 %v950_v1, %v950_v1  ;;  %v545_v5 = vpack.c.bf16 %v287_v3, %v286_v2  ;;  %v288_v6 = vld [vmem:[#allocation5 + $0x10] sm:$0xff]  ;;  %v289_v7 = vld [vmem:[#allocation5 + $0x18] sm:$0xff]  ;;  %s489_s11 = sshll.u32 %s821_s22, 7  ;;  %s254_s12 = scalar_lea.vmem [#allocation7], %s482_s17 }
  0x57   : > { %v548_v8 = vpack.c.bf16 %v289_v7, %v288_v6  ;;  %v290_v9 = vld [vmem:[#allocation5 + $0x20] sm:$0xff]  ;;  %v291_v10 = vld [vmem:[#allocation5 + $0x28] sm:$0xff]  ;;  %v292_v12 = vld [vmem:[#allocation5 + $0x30] sm:$0xff]  ;;  %541 = vmatprep.mubr.msk.f32.mxu0 %vm767_vm0, %v768_v20  ;;  %s395_s10 = sshll.u32 %s254_s12, 4  ;;  %s972_s28 = scalar_lea.hbm %s1021_s5, %s489_s11  ;;  %s974_s10 = int_to_ptr.vmem [resolvable:$true] %s395_s10 }
  0x58   : > { %546 = vmatpush3.bf16.msra.mxu0 %v545_v5  ;;  %v551_v11 = vpack.c.bf16 %v291_v10, %v290_v9  ;;  %v293_v13 = vld [vmem:[#allocation5 + $0x38] sm:$0xff]  ;;  %v294_v15 = vld [vmem:[#allocation5 + $0x40] sm:$0xff]  ;;  %v295_v16 = vld [vmem:[#allocation5 + $0x48] sm:$0xff]  ;;  %s382_s23 = scalar_lea.sflag [#allocation4], %s936_s16  ;;  %s690_s22 = scalar_lea.vmem %s974_s10, 128 }
  0x59   : > { %547 = vmatprep.subr.bf16.mxu0 %v766_v0  ;;  %v554_v14 = vpack.c.bf16 %v293_v13, %v292_v12  ;;  %v557_v17 = vpack.c.bf16 %v295_v16, %v294_v15  ;;  %v296_v18 = vld [vmem:[#allocation5 + $0x50] sm:$0xff]  ;;  %v297_v19 = vld [vmem:[#allocation5 + $0x58] sm:$0xff]  ;;  %v298_v22 = vld [vmem:[#allocation5 + $0x60] sm:$0xff]  ;;  %p691_p4 = scmp.ne.s32.totalorder %s974_s10, %s690_s22  ;;  %s769_s17 = smov [#allocation7]  }
  0x5a   : > { %263 = vadd.xlane.f32.xlu0 %v262_v4  ;;  %v560_v21 = vpack.c.bf16 %v297_v19, %v296_v18  ;;  %v299_v23 = vld [vmem:[#allocation5 + $0x68] sm:$0xff]  ;;  %v300_v25 = vld [vmem:[#allocation5 + $0x70] sm:$0xff]  ;;  %v301_v26 = vld [vmem:[#allocation5 + $0x78] sm:$0xff]  ;;  %s694_s27 = sshll.u32 %s769_s17, 4  ;;  %s695_s27 = int_to_ptr.vmem [resolvable:$false] %s694_s27 }
  0x5b   : > { %v563_v24 = vpack.c.bf16 %v299_v23, %v298_v22  ;;  %v566_v27 = vpack.c.bf16 %v301_v26, %v300_v25  ;;  %v485_v37 = vld [vmem:[%s1017_s1] ss:$0 sm:$0xff]  ;;  %p692_p6 = pnand %p691_p4, %p891_p12  ;;  %s696_s24 = scalar_lea.vmem %s695_s27, 256 }
  0x5c   : > { %549 = vmatpush3.bf16.msra.mxu0 %v548_v8  ;;  %v486_v39 = vld [vmem:[%s1018_s2] ss:$0 sm:$0xff]  ;;  %p697_p10 = scmp.lt.s32.totalorder %s974_s10, %s695_s27  ;;  %p698_p13 = scmp.lt.s32.totalorder %s696_s24, %s690_s22 }
  0x5d   : > { %550 = vmatprep.subr.bf16.mxu0 %v766_v0  ;;  %v487_v42 = vld [vmem:[%s1020_s4] ss:$0 sm:$0xff]  ;;  %p693_p8 = pneg %p692_p6 }
  0x5e   : > { %p699_p3 = por %p698_p13, %p697_p10 }
  0x60   : > { %552 = vmatpush3.bf16.msra.mxu0 %v551_v11  ;;  %p700_p7 = pnand %p699_p3, %p693_p8 }
  0x61   : > { %553 = vmatprep.subr.bf16.mxu0 %v766_v0 }
  0x64   : > { %555 = vmatpush3.bf16.msra.mxu0 %v554_v14 }
  0x65   : > { %556 = vmatprep.subr.bf16.mxu0 %v766_v0 }
  0x68   : > { %558 = vmatpush3.bf16.msra.mxu0 %v557_v17 }
  0x69   : > { %559 = vmatprep.subr.bf16.mxu0 %v766_v0 }
  0x6c   : > { %561 = vmatpush3.bf16.msra.mxu0 %v560_v21 }
  0x6d   : > { %562 = vmatprep.subr.bf16.mxu0 %v766_v0 }
  0x70   : > { %564 = vmatpush3.bf16.msra.mxu0 %v563_v24 }
  0x71   : > { %565 = vmatprep.subr.bf16.mxu0 %v766_v0 }
  0x74   : > { %567 = vmatpush3.bf16.msra.mxu0 %v566_v27 }
  0xe3   : > { %v259_v28 = vpop.xlane.xlu0 %258 }
  0xe4   : > { %v261_v29 = vmul.f32 0.0078125, %v259_v28 }
  0xe6   : > { %v266_v31 = vmul.f32 %v261_v29, %v261_v29  ;;  %v268_v35 = vsub.f32 %v950_v1, %v261_v29 }
  0xe7   : > { %v264_v30 = vpop.xlane.xlu0 %263 }
  0xe8   : > { %v265_v32 = vmul.f32 0.0078125, %v264_v30 }
  0xea   : > { %v267_v33 = vsub.f32 %v265_v32, %v266_v31 }
  0xec   : > { %v269_v34 = vadd.f32 1e-05, %v267_v33 }
  0xee   : > { %630 = vrsqrt.f32 %v269_v34 }
  0xf8   : > { %v631_v36 = vpop.eup %630 }
  0xf9   : > { %v271_v38 = vmul.f32 %v631_v36, %v268_v35 }
  0xfb   : > { %v278_v40 = vmul.f32 %v485_v37, %v271_v38 }
  0xfd   : > { %v285_v41 = vadd.f32 %v486_v39, %v278_v40 }
  0xff   : > { %542 = vmatmul.mubr.f32.vlgmr.msra.gmra.mrb[0].mxu0 %v285_v41 }
 0x1d2   : > { %v375_v43 = vpop.f32.mrb[0].mxu0 }
 0x1d3   : > { %v376_v44 = vadd.f32 %v487_v42, %v375_v43  ;;  %v543_v45 = vpop.f32.mrb[1].mxu0 }
 0x1d5   : > { %v379_v46 = vadd.f32 %v376_v44, %v950_v1 }
 0x1d7   : > { %380 = vst [vmem:[%s254_s12] sm:$0xff] %v379_v46 }
 0x1d8   : > { %703 = shalt.err (!%p700_p7)
}
 0x1d9   : > { %s704_s16 = scalar_lea.hbm %s972_s28, 128  ;;  %s708_s6 = scalar_lea.hbm %s1021_s5, 256 }
 0x1da   : > { %p705_p9 = scmp.ne.s32.totalorder %s972_s28, %s704_s16  ;;  %p709_p0 = scmp.lt.u32.totalorder %s972_s28, %s1021_s5 }
 0x1db   : > { %p710_p11 = scmp.lt.u32.totalorder %s708_s6, %s704_s16  ;;  %p712_p4 = scmp.lt.u32.totalorder %s704_s16, %s972_s28 }
 0x1dc   : > { %p706_p2 = pnand %p705_p9, %p891_p12 }
 0x1dd   : > { %p711_p1 = por %p710_p11, %p709_p0 }
 0x1de   : > { %p707_p5 = pneg %p706_p2 }
 0x1df   : > { %p713_p6 = por %p712_p4, %p711_p1 }
 0x1e1   : > { %p714_p8 = pnand %p713_p6, %p707_p5 }
 0x1e3   : > { %717 = shalt.err (!%p714_p8)
}
 0x1e4   : > { %574 = dma.vmem_to_hbm [thread:$0]  (%p891_p12), %s974_s10, 128, %s972_s28, %s382_s23  }
 0x1e5 PF: > { %s407_s11 = sand.u32 1, %s748_s18   ;;  %p1036_p10 = scmp.ne.s32.totalorder %s1026_s25, 0 }
 0x1e6   : > { %p1037_p13 = scmp.ge.s32.totalorder %s760_s21, 2  ;;  %s408_s12 = scalar_lea.sflag [#allocation4], %s407_s11 }
 0x1e8   : > { %p585_p3 = pnand %p1037_p13, %p1036_p10 }
 0x1ea   : > { %743 = dma.done.wait (!%p585_p3), %s408_s12, 128  }
 0x1eb   : > { %745 = vsyncadd (!%p585_p3), %s408_s12, 4294967168  ;;  %p19_p7 = scmp.ge.s32.totalorder %s856_s30, 4   ;;  %s1038_s18 = smov %s752_s19 }
 0x1ec   : > { %s1039_s19 = smov %s756_s20  ;;  %s1040_s20 = smov %s887_s8 }
 0x1ed   : > { %s1041_s21 = smov %s856_s30  ;;  %21 = sbr.rel (!%p19_p7) target bundleno = 6 (0x6), region = 89 }
 0x1f4   :  { %413 = vsyncpa [#allocation3], 1 }
 0x1f5   :  { %415 = vsyncpa [#allocation3 + $0x1], 1 }
 0x1f6   :  { %416 = vsyncpa [#allocation6], 1 }
 0x1f7   :  { %417 = vsyncpa [#allocation4], 1 }
 0x1f8   :  { %419 = vsyncpa [#allocation4 + $0x1], 1 }

</bundles_post_ra>
